<compile_context>
chip_gen: v6e
topology: v6e:2x2x1
jax: 0.10.0
libtpu: 0.0.40
codegen_flags: <defaults>
</compile_context>

<pallas_src>
import functools

import jax
import jax.numpy as jnp
from jax.experimental import pallas as pl
from jax.experimental.pallas import tpu as pltpu

BN_EPS = 1e-5
LANE = 128


def _round_up(n, m=LANE):
  return ((n + m - 1) // m) * m


def _pad2(a, rows, cols):
  return jnp.pad(a, ((0, rows - a.shape[0]), (0, cols - a.shape[1])))


# ---------------------------------------------------------------------------
# Kernel
# ---------------------------------------------------------------------------
def _vae_kernel(matmul_dtype, inv_b, dims,
                x_ref, eps_ref, w_ref, p_ref, recon_ref):
  """Fused VAE forward: encoder -> reparameterize -> decoder.

  w_ref: (K_total, N_max) row-stacked weight matrices (matmul dtype).
  p_ref: (14, N_max) f32 bias / gamma / beta rows.
  All slice offsets / widths are static multiples of 128 (lane-tile aligned).
  """
  ip, h0p, h1p, lp = dims
  # Row offsets of the stacked weight matrices (all multiples of 128).
  w_off = [0,
           ip,
           ip + h0p,
           ip + h0p + h1p,
           ip + h0p + h1p + lp,
           ip + h0p + h1p + lp + h1p]

  def linear(a, layer, k, n, bias_row):
    w = w_ref[w_off[layer]:w_off[layer] + k, :n]        # already matmul dtype
    b = p_ref[bias_row:bias_row + 1, :n]                # f32
    return jnp.dot(a.astype(matmul_dtype), w,
                   preferred_element_type=jnp.float32) + b

  def bn_tanh(h, g_row, bt_row, n):
    # Training-mode BatchNorm1d (biased batch stats) + tanh.  Single pass over
    # h: both reductions are independent and issued before any dependent VPU
    # work.  Padded feature columns stay exactly 0 (gamma/beta pads are 0).
    g = p_ref[g_row:g_row + 1, :n]
    bt = p_ref[bt_row:bt_row + 1, :n]
    s1 = jnp.sum(h, axis=0, keepdims=True)
    s2 = jnp.sum(h * h, axis=0, keepdims=True)
    mean = s1 * inv_b
    var = jnp.maximum(s2 * inv_b - mean * mean, 0.0)    # f32; guard cancellation
    return jnp.tanh((h - mean) * jax.lax.rsqrt(var + BN_EPS) * g + bt)

  x = x_ref[...]

  # ---- encoder: (Linear -> BN -> tanh) x2, then fused mu|logvar head ----
  h = bn_tanh(linear(x, 0, ip, h0p, 0), 1, 2, h0p)
  h = bn_tanh(linear(h, 1, h0p, h1p, 3), 4, 5, h1p)
  zz = linear(h, 2, h1p, 2 * lp, 6)                     # one N=2*lp matmul
  z_mu = zz[:, :lp]                                     # tile-aligned slices
  z_logvar = zz[:, lp:]

  # ---- reparameterize (f32 elementwise; exp goes to the EUP) ----
  z = z_mu + eps_ref[...] * jnp.exp(0.5 * z_logvar)

  # ---- decoder: (Linear -> BN -> tanh) x2, then Linear -> input_dim ----
  h = bn_tanh(linear(z, 3, lp, h1p, 7), 8, 9, h1p)
  h = bn_tanh(linear(h, 4, h1p, h0p, 10), 11, 12, h0p)
  recon_ref[...] = linear(h, 5, h0p, ip, 13)            # lane-dense store


# ---------------------------------------------------------------------------
# Parameters (PyTorch-equivalent layout: weights stored [in, out], y = xW + b)
# ---------------------------------------------------------------------------
def make_vae_params(key, input_dim, encoder_hidden_sizes, latent_dim):
  """Deterministic synthetic params, unpadded (exact PyTorch-style shapes)."""
  dec_hidden = list(reversed(encoder_hidden_sizes))

  def linear(k, fan_in, fan_out):
    kw, kb = jax.random.split(k)
    bound = 1.0 / float(fan_in) ** 0.5
    w = jax.random.uniform(kw, (fan_in, fan_out), jnp.float32, -bound, bound)
    b = jax.random.uniform(kb, (1, fan_out), jnp.float32, -bound, bound)
    return w, b

  def bn(width):
    return (jnp.ones((1, width), jnp.float32),
            jnp.zeros((1, width), jnp.float32))

  keys = jax.random.split(key, 6)
  params = []

  enc_sizes = [input_dim] + list(encoder_hidden_sizes) + [2 * latent_dim]
  for i in range(len(enc_sizes) - 1):
    w, b = linear(keys[i], enc_sizes[i], enc_sizes[i + 1])
    params += [w, b]
    if i < len(enc_sizes) - 2:                 # hidden layers get BN
      params += list(bn(enc_sizes[i + 1]))

  dec_sizes = [latent_dim] + dec_hidden + [input_dim]
  for i in range(len(dec_sizes) - 1):
    w, b = linear(keys[3 + i], dec_sizes[i], dec_sizes[i + 1])
    params += [w, b]
    if i < len(dec_sizes) - 2:
      params += list(bn(dec_sizes[i + 1]))

  return tuple(params)


def pack_vae_params(params, input_dim, encoder_hidden_sizes, latent_dim,
                    matmul_dtype):
  """Zero-pad every feature dim to a multiple of 128, fuse the mu/logvar head
  (mu -> cols [0, lp), logvar -> cols [lp, 2lp)), and pack everything into two
  buffers: stacked weights (matmul dtype) + stacked bias/gamma/beta rows (f32).
  Zero padding is mathematically transparent: padded columns stay exactly 0
  through Linear / BN / tanh."""
  (ew0, eb0, eg0, ebt0, ew1, eb1, eg1, ebt1, ew2, eb2,
   dw0, db0, dg0, dbt0, dw1, db1, dg1, dbt1, dw2, db2) = params
  h0, h1 = encoder_hidden_sizes
  ip, h0p, h1p, lp = (_round_up(d) for d in (input_dim, h0, h1, latent_dim))
  nmax = max(ip, h0p, h1p, 2 * lp)

  # Fused, re-padded encoder head (tile-aligned mu / logvar halves).
  ew2_f = jnp.concatenate(
      [_pad2(ew2[:, :latent_dim], h1p, lp),
       _pad2(ew2[:, latent_dim:], h1p, lp)], axis=1)
  eb2_f = jnp.concatenate(
      [_pad2(eb2[:, :latent_dim], 1, lp),
       _pad2(eb2[:, latent_dim:], 1, lp)], axis=1)

  weights = [
      _pad2(ew0, ip, h0p), _pad2(ew1, h0p, h1p), ew2_f,
      _pad2(dw0, lp, h1p), _pad2(dw1, h1p, h0p), _pad2(dw2, h0p, ip),
  ]
  w_packed = jnp.concatenate(
      [_pad2(w, w.shape[0], nmax) for w in weights], axis=0
  ).astype(matmul_dtype)

  rows = [
      (eb0, h0p), (eg0, h0p), (ebt0, h0p),
      (eb1, h1p), (eg1, h1p), (ebt1, h1p),
      (eb2_f, 2 * lp),
      (db0, h1p), (dg0, h1p), (dbt0, h1p),
      (db1, h0p), (dg1, h0p), (dbt1, h0p),
      (db2, ip),
  ]
  p_packed = jnp.concatenate(
      [_pad2(_pad2(r, 1, n), 1, nmax) for r, n in rows], axis=0)

  return w_packed, p_packed, (ip, h0p, h1p, lp)


# ---------------------------------------------------------------------------
# pallas_call wrapper
# ---------------------------------------------------------------------------
def vae_apply(x, eps, params, input_dim, encoder_hidden_sizes, latent_dim,
              matmul_dtype=jnp.bfloat16):
  """Pads features to lane width, runs the fused kernel, slices the output.

  matmul_dtype controls MXU operand precision only (default bf16, native on
  v5e/v6e/v7x); accumulation, bias add and all BN / tanh / exp math stay f32.
  """
  B = x.shape[0]
  w_packed, p_packed, dims = pack_vae_params(
      params, input_dim, encoder_hidden_sizes, latent_dim, matmul_dtype)
  ip, h0p, h1p, lp = dims
  nmax = w_packed.shape[1]

  # NOTE: the batch dim is NOT padded — BatchNorm training statistics must be
  # computed over the real batch rows only (inv_b = 1/B in the kernel).
  x_pad = jnp.pad(x, ((0, 0), (0, ip - input_dim)))
  eps_pad = jnp.pad(eps, ((0, 0), (0, lp - latent_dim)))

  # Advisory cost estimate for the XLA scheduler around the custom call.
  flops = 2 * B * (ip * h0p + h0p * h1p + h1p * 2 * lp
                   + lp * h1p + h1p * h0p + h0p * ip)
  transcendentals = B * (2 * (h0p + h1p) + lp) + 2 * (h0p + h1p)
  in_out_bytes = (x_pad.size * 4 + eps_pad.size * 4
                  + w_packed.size * w_packed.dtype.itemsize
                  + p_packed.size * 4 + B * ip * 4)

  # VMEM budget: gridless call -> single-buffered residents + f32 activation
  # temporaries; capped at 48 MiB (headroom under v7x's 64 MiB physical).
  vmem_needed = in_out_bytes + 8 * B * nmax * 4 + (2 << 20)
  vmem_limit = int(min(48 << 20, max(16 << 20, vmem_needed)))

  vmem_spec = pl.BlockSpec(memory_space=pltpu.MemorySpace.VMEM)
  kernel = functools.partial(_vae_kernel, matmul_dtype, 1.0 / float(B), dims)

  recon_pad = pl.pallas_call(
      kernel,
      out_shape=jax.ShapeDtypeStruct((B, ip), jnp.float32),
      in_specs=[vmem_spec] * 4,
      out_specs=vmem_spec,
      compiler_params=pltpu.CompilerParams(vmem_limit_bytes=vmem_limit),
      cost_estimate=pl.CostEstimate(
          flops=int(flops),
          transcendentals=int(transcendentals),
          bytes_accessed=int(in_out_bytes)),
  )(x_pad, eps_pad, w_packed, p_packed)

  return recon_pad[:, :input_dim]


# ---------------------------------------------------------------------------
# Pure-JAX reference (exact PyTorch forward semantics, unpadded)
# ---------------------------------------------------------------------------
def vae_forward_ref(x, eps, params, latent_dim):
  (ew0, eb0, eg0, ebt0, ew1, eb1, eg1, ebt1, ew2, eb2,
   dw0, db0, dg0, dbt0, dw1, db1, dg1, dbt1, dw2, db2) = params

  def bn(h, g, bt):
    m = jnp.mean(h, axis=0, keepdims=True)
    v = jnp.mean((h - m) ** 2, axis=0, keepdims=True)
    return (h - m) * jax.lax.rsqrt(v + BN_EPS) * g + bt

  h = jnp.tanh(bn(x @ ew0 + eb0, eg0, ebt0))
  h = jnp.tanh(bn(h @ ew1 + eb1, eg1, ebt1))
  zz = h @ ew2 + eb2
  z_mu, z_logvar = zz[:, :latent_dim], zz[:, latent_dim:]
  z = z_mu + eps * jnp.exp(0.5 * z_logvar)
  h = jnp.tanh(bn(z @ dw0 + db0, dg0, dbt0))
  h = jnp.tanh(bn(h @ dw1 + db1, dg1, dbt1))
  return h @ dw2 + db2


if __name__ == "__main__":
  # Small config consistent with the module: x is [batch, input_dim].
  batch = 8
  input_dim = 16
  encoder_hidden_sizes = [32, 32]
  latent_dim = 4

  key = jax.random.PRNGKey(0)
  k_x, k_eps, k_p = jax.random.split(key, 3)

  x = jax.random.normal(k_x, (batch, input_dim), jnp.float32)
  # torch.randn_like(z_std) -> standard-normal noise generated outside.
  eps = jax.random.normal(k_eps, (batch, latent_dim), jnp.float32)
  params = make_vae_params(k_p, input_dim, encoder_hidden_sizes, latent_dim)

  ref = vae_forward_ref(x, eps, params, latent_dim)

  # f32 MXU-operand path: must match the PyTorch-semantics reference closely
  # (tolerance covers the algebraically equivalent single-pass BN variance).
  recon_f32 = jax.block_until_ready(
      vae_apply(x, eps, params, input_dim, encoder_hidden_sizes, latent_dim,
                matmul_dtype=jnp.float32))
  assert recon_f32.shape == (batch, input_dim)
  assert jnp.allclose(recon_f32, ref, atol=1e-4, rtol=1e-4)

  # Default path: bf16 MXU operands (native on v5e/v6e/v7x), f32 accumulation
  # and f32 BN / tanh / exp.
  recon = jax.block_until_ready(
      vae_apply(x, eps, params, input_dim, encoder_hidden_sizes, latent_dim))
  assert recon.shape == (batch, input_dim)
  assert bool(jnp.all(jnp.isfinite(recon)))
  assert float(jnp.max(jnp.abs(recon - ref))) < 0.1

  print("KERNEL_OK")
</pallas_src>

<mosaic_0001>
module attributes {stable_mosaic.version = 11 : i64} {
  func.func @_vae_kernel(%arg0: memref<8x128xf32, #tpu.memory_space<vmem>>, %arg1: memref<8x128xf32, #tpu.memory_space<vmem>>, %arg2: memref<768x256xf32, #tpu.memory_space<vmem>>, %arg3: memref<14x256xf32, #tpu.memory_space<vmem>>, %arg4: memref<8x128xf32, #tpu.memory_space<vmem>>) attributes {dimension_semantics = [], scalar_prefetch = 0 : i64, scratch_operands = 0 : i64, tpu.core_type = #tpu.core_type<tc>} {
    %c0 = arith.constant 0 : index
    %c0_0 = arith.constant 0 : index
    %0 = vector.load %arg0[%c0, %c0_0] : memref<8x128xf32, #tpu.memory_space<vmem>>, vector<8x128xf32>
    %c0_1 = arith.constant 0 : index
    %c0_2 = arith.constant 0 : index
    %1 = vector.load %arg2[%c0_1, %c0_2] : memref<768x256xf32, #tpu.memory_space<vmem>>, vector<128x128xf32>
    %c0_3 = arith.constant 0 : index
    %c0_4 = arith.constant 0 : index
    %2 = vector.load %arg3[%c0_3, %c0_4] : memref<14x256xf32, #tpu.memory_space<vmem>>, vector<1x128xf32>
    %cst = arith.constant dense<0.000000e+00> : vector<8x128xf32>
    %3 = tpu.matmul %0, %1, %cst {dimension_numbers = #tpu.dot_dimension_numbers<[1], [0], [0], [1], [0, 0, 1, 1], [], []>} : vector<8x128xf32>, vector<128x128xf32>, vector<8x128xf32> -> vector<8x128xf32>
    %4 = vector.broadcast %2 : vector<1x128xf32> to vector<8x128xf32>
    %5 = arith.addf %3, %4 : vector<8x128xf32>
    %c1 = arith.constant 1 : index
    %c0_5 = arith.constant 0 : index
    %6 = vector.load %arg3[%c1, %c0_5] : memref<14x256xf32, #tpu.memory_space<vmem>>, vector<1x128xf32>
    %c2 = arith.constant 2 : index
    %c0_6 = arith.constant 0 : index
    %7 = vector.load %arg3[%c2, %c0_6] : memref<14x256xf32, #tpu.memory_space<vmem>>, vector<1x128xf32>
    %cst_7 = arith.constant dense<0.000000e+00> : vector<128xf32>
    %8 = vector.multi_reduction <add>, %5, %cst_7 [0] : vector<8x128xf32> to vector<128xf32>
    %9 = vector.shape_cast %8 : vector<128xf32> to vector<1x128xf32>
    %10 = arith.mulf %5, %5 : vector<8x128xf32>
    %cst_8 = arith.constant dense<0.000000e+00> : vector<128xf32>
    %11 = vector.multi_reduction <add>, %10, %cst_8 [0] : vector<8x128xf32> to vector<128xf32>
    %12 = vector.shape_cast %11 : vector<128xf32> to vector<1x128xf32>
    %cst_9 = arith.constant 1.250000e-01 : f32
    %13 = vector.broadcast %cst_9 : f32 to vector<1x128xf32>
    %14 = arith.mulf %9, %13 : vector<1x128xf32>
    %cst_10 = arith.constant 1.250000e-01 : f32
    %15 = vector.broadcast %cst_10 : f32 to vector<1x128xf32>
    %16 = arith.mulf %12, %15 : vector<1x128xf32>
    %17 = arith.mulf %14, %14 : vector<1x128xf32>
    %18 = arith.subf %16, %17 : vector<1x128xf32>
    %cst_11 = arith.constant 0.000000e+00 : f32
    %19 = vector.broadcast %cst_11 : f32 to vector<1x128xf32>
    %20 = arith.maximumf %18, %19 : vector<1x128xf32>
    %21 = vector.broadcast %14 : vector<1x128xf32> to vector<8x128xf32>
    %22 = arith.subf %5, %21 : vector<8x128xf32>
    %cst_12 = arith.constant 9.99999974E-6 : f32
    %23 = vector.broadcast %cst_12 : f32 to vector<1x128xf32>
    %24 = arith.addf %20, %23 : vector<1x128xf32>
    %25 = math.rsqrt %24 : vector<1x128xf32>
    %26 = vector.broadcast %25 : vector<1x128xf32> to vector<8x128xf32>
    %27 = arith.mulf %22, %26 : vector<8x128xf32>
    %28 = vector.broadcast %6 : vector<1x128xf32> to vector<8x128xf32>
    %29 = arith.mulf %27, %28 : vector<8x128xf32>
    %30 = vector.broadcast %7 : vector<1x128xf32> to vector<8x128xf32>
    %31 = arith.addf %29, %30 : vector<8x128xf32>
    %32 = math.tanh %31 : vector<8x128xf32>
    %c128 = arith.constant 128 : index
    %c0_13 = arith.constant 0 : index
    %33 = vector.load %arg2[%c128, %c0_13] : memref<768x256xf32, #tpu.memory_space<vmem>>, vector<128x128xf32>
    %c3 = arith.constant 3 : index
    %c0_14 = arith.constant 0 : index
    %34 = vector.load %arg3[%c3, %c0_14] : memref<14x256xf32, #tpu.memory_space<vmem>>, vector<1x128xf32>
    %cst_15 = arith.constant dense<0.000000e+00> : vector<8x128xf32>
    %35 = tpu.matmul %32, %33, %cst_15 {dimension_numbers = #tpu.dot_dimension_numbers<[1], [0], [0], [1], [0, 0, 1, 1], [], []>} : vector<8x128xf32>, vector<128x128xf32>, vector<8x128xf32> -> vector<8x128xf32>
    %36 = vector.broadcast %34 : vector<1x128xf32> to vector<8x128xf32>
    %37 = arith.addf %35, %36 : vector<8x128xf32>
    %c4 = arith.constant 4 : index
    %c0_16 = arith.constant 0 : index
    %38 = vector.load %arg3[%c4, %c0_16] : memref<14x256xf32, #tpu.memory_space<vmem>>, vector<1x128xf32>
    %c5 = arith.constant 5 : index
    %c0_17 = arith.constant 0 : index
    %39 = vector.load %arg3[%c5, %c0_17] : memref<14x256xf32, #tpu.memory_space<vmem>>, vector<1x128xf32>
    %cst_18 = arith.constant dense<0.000000e+00> : vector<128xf32>
    %40 = vector.multi_reduction <add>, %37, %cst_18 [0] : vector<8x128xf32> to vector<128xf32>
    %41 = vector.shape_cast %40 : vector<128xf32> to vector<1x128xf32>
    %42 = arith.mulf %37, %37 : vector<8x128xf32>
    %cst_19 = arith.constant dense<0.000000e+00> : vector<128xf32>
    %43 = vector.multi_reduction <add>, %42, %cst_19 [0] : vector<8x128xf32> to vector<128xf32>
    %44 = vector.shape_cast %43 : vector<128xf32> to vector<1x128xf32>
    %cst_20 = arith.constant 1.250000e-01 : f32
    %45 = vector.broadcast %cst_20 : f32 to vector<1x128xf32>
    %46 = arith.mulf %41, %45 : vector<1x128xf32>
    %cst_21 = arith.constant 1.250000e-01 : f32
    %47 = vector.broadcast %cst_21 : f32 to vector<1x128xf32>
    %48 = arith.mulf %44, %47 : vector<1x128xf32>
    %49 = arith.mulf %46, %46 : vector<1x128xf32>
    %50 = arith.subf %48, %49 : vector<1x128xf32>
    %cst_22 = arith.constant 0.000000e+00 : f32
    %51 = vector.broadcast %cst_22 : f32 to vector<1x128xf32>
    %52 = arith.maximumf %50, %51 : vector<1x128xf32>
    %53 = vector.broadcast %46 : vector<1x128xf32> to vector<8x128xf32>
    %54 = arith.subf %37, %53 : vector<8x128xf32>
    %cst_23 = arith.constant 9.99999974E-6 : f32
    %55 = vector.broadcast %cst_23 : f32 to vector<1x128xf32>
    %56 = arith.addf %52, %55 : vector<1x128xf32>
    %57 = math.rsqrt %56 : vector<1x128xf32>
    %58 = vector.broadcast %57 : vector<1x128xf32> to vector<8x128xf32>
    %59 = arith.mulf %54, %58 : vector<8x128xf32>
    %60 = vector.broadcast %38 : vector<1x128xf32> to vector<8x128xf32>
    %61 = arith.mulf %59, %60 : vector<8x128xf32>
    %62 = vector.broadcast %39 : vector<1x128xf32> to vector<8x128xf32>
    %63 = arith.addf %61, %62 : vector<8x128xf32>
    %64 = math.tanh %63 : vector<8x128xf32>
    %c256 = arith.constant 256 : index
    %c0_24 = arith.constant 0 : index
    %65 = vector.load %arg2[%c256, %c0_24] : memref<768x256xf32, #tpu.memory_space<vmem>>, vector<128x256xf32>
    %c6 = arith.constant 6 : index
    %c0_25 = arith.constant 0 : index
    %66 = vector.load %arg3[%c6, %c0_25] : memref<14x256xf32, #tpu.memory_space<vmem>>, vector<1x256xf32>
    %cst_26 = arith.constant dense<0.000000e+00> : vector<8x256xf32>
    %67 = tpu.matmul %64, %65, %cst_26 {dimension_numbers = #tpu.dot_dimension_numbers<[1], [0], [0], [1], [0, 0, 1, 1], [], []>} : vector<8x128xf32>, vector<128x256xf32>, vector<8x256xf32> -> vector<8x256xf32>
    %68 = vector.broadcast %66 : vector<1x256xf32> to vector<8x256xf32>
    %69 = arith.addf %67, %68 : vector<8x256xf32>
    %70 = vector.extract_strided_slice %69 {offsets = [0, 0], sizes = [8, 128], strides = [1, 1]} : vector<8x256xf32> to vector<8x128xf32>
    %71 = vector.extract_strided_slice %69 {offsets = [0, 128], sizes = [8, 128], strides = [1, 1]} : vector<8x256xf32> to vector<8x128xf32>
    %c0_27 = arith.constant 0 : index
    %c0_28 = arith.constant 0 : index
    %72 = vector.load %arg1[%c0_27, %c0_28] : memref<8x128xf32, #tpu.memory_space<vmem>>, vector<8x128xf32>
    %cst_29 = arith.constant 5.000000e-01 : f32
    %73 = vector.broadcast %cst_29 : f32 to vector<8x128xf32>
    %74 = arith.mulf %73, %71 : vector<8x128xf32>
    %75 = math.exp %74 : vector<8x128xf32>
    %76 = arith.mulf %72, %75 : vector<8x128xf32>
    %77 = arith.addf %70, %76 : vector<8x128xf32>
    %c384 = arith.constant 384 : index
    %c0_30 = arith.constant 0 : index
    %78 = vector.load %arg2[%c384, %c0_30] : memref<768x256xf32, #tpu.memory_space<vmem>>, vector<128x128xf32>
    %c7 = arith.constant 7 : index
    %c0_31 = arith.constant 0 : index
    %79 = vector.load %arg3[%c7, %c0_31] : memref<14x256xf32, #tpu.memory_space<vmem>>, vector<1x128xf32>
    %cst_32 = arith.constant dense<0.000000e+00> : vector<8x128xf32>
    %80 = tpu.matmul %77, %78, %cst_32 {dimension_numbers = #tpu.dot_dimension_numbers<[1], [0], [0], [1], [0, 0, 1, 1], [], []>} : vector<8x128xf32>, vector<128x128xf32>, vector<8x128xf32> -> vector<8x128xf32>
    %81 = vector.broadcast %79 : vector<1x128xf32> to vector<8x128xf32>
    %82 = arith.addf %80, %81 : vector<8x128xf32>
    %c8 = arith.constant 8 : index
    %c0_33 = arith.constant 0 : index
    %83 = vector.load %arg3[%c8, %c0_33] : memref<14x256xf32, #tpu.memory_space<vmem>>, vector<1x128xf32>
    %c9 = arith.constant 9 : index
    %c0_34 = arith.constant 0 : index
    %84 = vector.load %arg3[%c9, %c0_34] : memref<14x256xf32, #tpu.memory_space<vmem>>, vector<1x128xf32>
    %cst_35 = arith.constant dense<0.000000e+00> : vector<128xf32>
    %85 = vector.multi_reduction <add>, %82, %cst_35 [0] : vector<8x128xf32> to vector<128xf32>
    %86 = vector.shape_cast %85 : vector<128xf32> to vector<1x128xf32>
    %87 = arith.mulf %82, %82 : vector<8x128xf32>
    %cst_36 = arith.constant dense<0.000000e+00> : vector<128xf32>
    %88 = vector.multi_reduction <add>, %87, %cst_36 [0] : vector<8x128xf32> to vector<128xf32>
    %89 = vector.shape_cast %88 : vector<128xf32> to vector<1x128xf32>
    %cst_37 = arith.constant 1.250000e-01 : f32
    %90 = vector.broadcast %cst_37 : f32 to vector<1x128xf32>
    %91 = arith.mulf %86, %90 : vector<1x128xf32>
    %cst_38 = arith.constant 1.250000e-01 : f32
    %92 = vector.broadcast %cst_38 : f32 to vector<1x128xf32>
    %93 = arith.mulf %89, %92 : vector<1x128xf32>
    %94 = arith.mulf %91, %91 : vector<1x128xf32>
    %95 = arith.subf %93, %94 : vector<1x128xf32>
    %cst_39 = arith.constant 0.000000e+00 : f32
    %96 = vector.broadcast %cst_39 : f32 to vector<1x128xf32>
    %97 = arith.maximumf %95, %96 : vector<1x128xf32>
    %98 = vector.broadcast %91 : vector<1x128xf32> to vector<8x128xf32>
    %99 = arith.subf %82, %98 : vector<8x128xf32>
    %cst_40 = arith.constant 9.99999974E-6 : f32
    %100 = vector.broadcast %cst_40 : f32 to vector<1x128xf32>
    %101 = arith.addf %97, %100 : vector<1x128xf32>
    %102 = math.rsqrt %101 : vector<1x128xf32>
    %103 = vector.broadcast %102 : vector<1x128xf32> to vector<8x128xf32>
    %104 = arith.mulf %99, %103 : vector<8x128xf32>
    %105 = vector.broadcast %83 : vector<1x128xf32> to vector<8x128xf32>
    %106 = arith.mulf %104, %105 : vector<8x128xf32>
    %107 = vector.broadcast %84 : vector<1x128xf32> to vector<8x128xf32>
    %108 = arith.addf %106, %107 : vector<8x128xf32>
    %109 = math.tanh %108 : vector<8x128xf32>
    %c512 = arith.constant 512 : index
    %c0_41 = arith.constant 0 : index
    %110 = vector.load %arg2[%c512, %c0_41] : memref<768x256xf32, #tpu.memory_space<vmem>>, vector<128x128xf32>
    %c10 = arith.constant 10 : index
    %c0_42 = arith.constant 0 : index
    %111 = vector.load %arg3[%c10, %c0_42] : memref<14x256xf32, #tpu.memory_space<vmem>>, vector<1x128xf32>
    %cst_43 = arith.constant dense<0.000000e+00> : vector<8x128xf32>
    %112 = tpu.matmul %109, %110, %cst_43 {dimension_numbers = #tpu.dot_dimension_numbers<[1], [0], [0], [1], [0, 0, 1, 1], [], []>} : vector<8x128xf32>, vector<128x128xf32>, vector<8x128xf32> -> vector<8x128xf32>
    %113 = vector.broadcast %111 : vector<1x128xf32> to vector<8x128xf32>
    %114 = arith.addf %112, %113 : vector<8x128xf32>
    %c11 = arith.constant 11 : index
    %c0_44 = arith.constant 0 : index
    %115 = vector.load %arg3[%c11, %c0_44] : memref<14x256xf32, #tpu.memory_space<vmem>>, vector<1x128xf32>
    %c12 = arith.constant 12 : index
    %c0_45 = arith.constant 0 : index
    %116 = vector.load %arg3[%c12, %c0_45] : memref<14x256xf32, #tpu.memory_space<vmem>>, vector<1x128xf32>
    %cst_46 = arith.constant dense<0.000000e+00> : vector<128xf32>
    %117 = vector.multi_reduction <add>, %114, %cst_46 [0] : vector<8x128xf32> to vector<128xf32>
    %118 = vector.shape_cast %117 : vector<128xf32> to vector<1x128xf32>
    %119 = arith.mulf %114, %114 : vector<8x128xf32>
    %cst_47 = arith.constant dense<0.000000e+00> : vector<128xf32>
    %120 = vector.multi_reduction <add>, %119, %cst_47 [0] : vector<8x128xf32> to vector<128xf32>
    %121 = vector.shape_cast %120 : vector<128xf32> to vector<1x128xf32>
    %cst_48 = arith.constant 1.250000e-01 : f32
    %122 = vector.broadcast %cst_48 : f32 to vector<1x128xf32>
    %123 = arith.mulf %118, %122 : vector<1x128xf32>
    %cst_49 = arith.constant 1.250000e-01 : f32
    %124 = vector.broadcast %cst_49 : f32 to vector<1x128xf32>
    %125 = arith.mulf %121, %124 : vector<1x128xf32>
    %126 = arith.mulf %123, %123 : vector<1x128xf32>
    %127 = arith.subf %125, %126 : vector<1x128xf32>
    %cst_50 = arith.constant 0.000000e+00 : f32
    %128 = vector.broadcast %cst_50 : f32 to vector<1x128xf32>
    %129 = arith.maximumf %127, %128 : vector<1x128xf32>
    %130 = vector.broadcast %123 : vector<1x128xf32> to vector<8x128xf32>
    %131 = arith.subf %114, %130 : vector<8x128xf32>
    %cst_51 = arith.constant 9.99999974E-6 : f32
    %132 = vector.broadcast %cst_51 : f32 to vector<1x128xf32>
    %133 = arith.addf %129, %132 : vector<1x128xf32>
    %134 = math.rsqrt %133 : vector<1x128xf32>
    %135 = vector.broadcast %134 : vector<1x128xf32> to vector<8x128xf32>
    %136 = arith.mulf %131, %135 : vector<8x128xf32>
    %137 = vector.broadcast %115 : vector<1x128xf32> to vector<8x128xf32>
    %138 = arith.mulf %136, %137 : vector<8x128xf32>
    %139 = vector.broadcast %116 : vector<1x128xf32> to vector<8x128xf32>
    %140 = arith.addf %138, %139 : vector<8x128xf32>
    %141 = math.tanh %140 : vector<8x128xf32>
    %c640 = arith.constant 640 : index
    %c0_52 = arith.constant 0 : index
    %142 = vector.load %arg2[%c640, %c0_52] : memref<768x256xf32, #tpu.memory_space<vmem>>, vector<128x128xf32>
    %c13 = arith.constant 13 : index
    %c0_53 = arith.constant 0 : index
    %143 = vector.load %arg3[%c13, %c0_53] : memref<14x256xf32, #tpu.memory_space<vmem>>, vector<1x128xf32>
    %cst_54 = arith.constant dense<0.000000e+00> : vector<8x128xf32>
    %144 = tpu.matmul %141, %142, %cst_54 {dimension_numbers = #tpu.dot_dimension_numbers<[1], [0], [0], [1], [0, 0, 1, 1], [], []>} : vector<8x128xf32>, vector<128x128xf32>, vector<8x128xf32> -> vector<8x128xf32>
    %145 = vector.broadcast %143 : vector<1x128xf32> to vector<8x128xf32>
    %146 = arith.addf %144, %145 : vector<8x128xf32>
    %c0_55 = arith.constant 0 : index
    %c0_56 = arith.constant 0 : index
    %147 = vector.load %arg4[%c0_55, %c0_56] : memref<8x128xf32, #tpu.memory_space<vmem>>, vector<8x128xf32>
    tpu.vector_store %arg4[%c0_55, %c0_56], %146 {strides = array<i32>} : memref<8x128xf32, #tpu.memory_space<vmem>>, vector<8x128xf32>,
    return
  }
}

</mosaic_0001>

<bundles_post_ra>
// kernel: tpu_custom_call.1
= control target key start
LH: loop header
LB: loop body
LE: loop exit
PB: predicated region body
PF: predicated region fallthrough
CT: control target
= control target key end

     0   :  { %9 = vsyncpa [#allocation3], 0  ;;  %s1288_s0 = inlined_call_operand.hbm [shape: f32[8,128], index: 0, kind: input, shape index: {}]   ;;  %s1289_s1 = inlined_call_operand.hbm [shape: f32[8,128], index: 1, kind: input, shape index: {}]   ;;  %s1290_s2 = inlined_call_operand.hbm [shape: f32[768,256], index: 2, kind: input, shape index: {}]   ;;  %s1291_s3 = inlined_call_operand.hbm [shape: f32[14,256], index: 3, kind: input, shape index: {}]   ;;  %s1292_s4 = inlined_call_operand.hbm [shape: f32[8,128], index: 4, kind: output, shape index: {}]  }
   0x1   :  { %10 = vsyncpa [#allocation6], 0 }
   0x2   :  { %11 = vsyncpa [#allocation9], 0 }
   0x3   :  { %12 = vsyncpa [#allocation4], 0  ;;  %s1148_s15 = smov [#allocation5]   ;;  %s1149_s17 = smov [#allocation2]  }
   0x4   :  { %s29_s16 = sshll.u32 %s1148_s15, 4  ;;  %s19_s18 = sshll.u32 %s1149_s17, 4  ;;  %s30_s16 = int_to_ptr.vmem [resolvable:$true] %s29_s16  ;;  %s20_s18 = int_to_ptr.vmem [resolvable:$true] %s19_s18 }
   0x5   :  { %s1048_s19 = scalar_lea.vmem %s30_s16, 128  ;;  %p1053_p1 = scmp.lt.s32.totalorder %s30_s16, %s30_s16 }
   0x6   :  { %p1049_p0 = scmp.ne.s32.totalorder %s30_s16, %s1048_s19  ;;  %p1054_p2 = scmp.lt.s32.totalorder %s1048_s19, %s1048_s19 }
   0x8   :  { %p1055_p3 = por %p1054_p2, %p1053_p1 }
   0xa   :  { %p1056_p4 = pnand %p1055_p3, %p1049_p0 }
   0xc   :  { %1059 = shalt.err (!%p1056_p4)
}
   0xd   :  { %32 = dma.hbm_to_vmem [thread:$0]  %s1289_s1, 128, %s30_s16, [#allocation6]  }
   0xe   :  { %s1068_s22 = scalar_lea.vmem %s20_s18, 128  ;;  %p1073_p6 = scmp.lt.s32.totalorder %s20_s18, %s20_s18 }
   0xf   :  { %p1069_p5 = scmp.ne.s32.totalorder %s20_s18, %s1068_s22  ;;  %p1074_p7 = scmp.lt.s32.totalorder %s1068_s22, %s1068_s22 }
  0x11   :  { %p1075_p8 = por %p1074_p7, %p1073_p6 }
  0x13   :  { %p1076_p9 = pnand %p1075_p8, %p1069_p5 }
  0x15   :  { %1079 = shalt.err (!%p1076_p9)
}
  0x16   :  { %22 = dma.hbm_to_vmem [thread:$0]  %s1288_s0, 128, %s20_s18, [#allocation3]  }
  0x17   :  { %s1150_s25 = smov [#allocation7]  }
  0x18   :  { %s38_s26 = sshll.u32 %s1150_s25, 4  ;;  %s39_s26 = int_to_ptr.vmem [resolvable:$true] %s38_s26 }
  0x19   :  { %s1088_s27 = scalar_lea.vmem %s39_s26, 24576  ;;  %p1093_p11 = scmp.lt.s32.totalorder %s39_s26, %s39_s26 }
  0x1a   :  { %p1089_p10 = scmp.ne.s32.totalorder %s39_s26, %s1088_s27  ;;  %p1094_p12 = scmp.lt.s32.totalorder %s1088_s27, %s1088_s27 }
  0x1c   :  { %p1095_p13 = por %p1094_p12, %p1093_p11 }
  0x1e   :  { %p1096_p0 = pnand %p1095_p13, %p1089_p10 }
  0x20   :  { %1099 = shalt.err (!%p1096_p0)
}
  0x21   :  { %s1151_s1 = smov 256   ;;  %s1152_s28 = smov 16  }
  0x22   :  { %44 = dma.hbm_to_vmem [thread:$0]  %s1290_s2, 24576, %s39_s26, [#allocation6], %s1151_s1, %s1151_s1, %s1152_s28  }
  0x23   :  { %s1153_s5 = smov [#allocation8]  }
  0x24   :  { %s50_s6 = sshll.u32 %s1153_s5, 4  ;;  %s51_s6 = int_to_ptr.vmem [resolvable:$true] %s50_s6 }
  0x25   :  { %s1108_s0 = scalar_lea.vmem %s51_s6, 512  ;;  %p1113_p2 = scmp.lt.s32.totalorder %s51_s6, %s51_s6 }
  0x26   :  { %p1109_p1 = scmp.ne.s32.totalorder %s51_s6, %s1108_s0  ;;  %p1114_p3 = scmp.lt.s32.totalorder %s1108_s0, %s1108_s0 }
  0x28   :  { %p1115_p4 = por %p1114_p3, %p1113_p2 }
  0x2a   :  { %p1116_p5 = pnand %p1115_p4, %p1109_p1 }
  0x2c   :  { %1119 = shalt.err (!%p1116_p5)
}
  0x2d   :  { %56 = dma.hbm_to_vmem [thread:$0]  %s1291_s3, 512, %s51_s6, [#allocation9], %s1151_s1, %s1151_s1, %s1152_s28  }
  0x2e   :  { %1140 = dma.done.wait [#allocation3], 128  }
  0x2f   :  { %1141 = vsyncadd [#allocation3], 4294967168 }
  0x30   :  { %1142 = dma.done.wait [#allocation6], 24704  }
  0x31   :  { %1143 = vsyncadd [#allocation6], 4294942592 }
  0x32   :  { %1144 = dma.done.wait [#allocation9], 512  }
  0x33   :  { %1145 = vsyncadd [#allocation9], 4294966784  ;;  %v1154_v0 = vmov 0.0   ;;  %vm1155_vm0 = vmmov 0   ;;  %v85_v1 = vld [vmem:[#allocation7 + $0xf0] sm:$0xff]  ;;  %v84_v2 = vld [vmem:[#allocation7 + $0xe0] sm:$0xff] }
  0x34   :  { %838 = vmatprep.subr.mxu0 %v1154_v0  ;;  %870 = vmatprep.mubr.msk.f32.mxu0 %vm1155_vm0, %v1154_v0  ;;  %v83_v3 = vld [vmem:[#allocation7 + $0xd0] sm:$0xff]  ;;  %v82_v4 = vld [vmem:[#allocation7 + $0xc0] sm:$0xff]  ;;  %s1156_s2 = smov [#allocation10]  }
  0x35   :  { %873 = vmatprep.subr.mxu1 %v1154_v0  ;;  %905 = vmatprep.mubr.msk.f32.mxu1 %vm1155_vm0, %v1154_v0  ;;  %v81_v5 = vld [vmem:[#allocation7 + $0xb0] sm:$0xff]  ;;  %v80_v6 = vld [vmem:[#allocation7 + $0xa0] sm:$0xff]  ;;  %s742_s3 = sshll.u32 %s1156_s2, 4  ;;  %s743_s3 = int_to_ptr.vmem [resolvable:$true] %s742_s3 }
  0x36   :  { %839 = vmatpush3.msra.mxu0 %v85_v1  ;;  %v79_v7 = vld [vmem:[#allocation7 + $0x90] sm:$0xff]  ;;  %v78_v8 = vld [vmem:[#allocation7 + $0x80] sm:$0xff]  ;;  %s1120_s9 = scalar_lea.vmem %s743_s3, 128  ;;  %p1125_p7 = scmp.lt.s32.totalorder %s743_s3, %s743_s3 }
  0x37   :  { %840 = vmatprep.subr.mxu0 %v1154_v0  ;;  %v77_v9 = vld [vmem:[#allocation7 + $0x70] sm:$0xff]  ;;  %v76_v10 = vld [vmem:[#allocation7 + $0x60] sm:$0xff]  ;;  %p1121_p6 = scmp.ne.s32.totalorder %s743_s3, %s1120_s9  ;;  %p1126_p8 = scmp.lt.s32.totalorder %s1120_s9, %s1120_s9 }
  0x38   :  { %841 = vmatpush3.msra.mxu0 %v84_v2  ;;  %v75_v11 = vld [vmem:[#allocation7 + $0x50] sm:$0xff]  ;;  %v74_v12 = vld [vmem:[#allocation7 + $0x40] sm:$0xff]  ;;  %v329_v2 = vld [vmem:[#allocation7 + $0x2f8] sm:$0xff] }
  0x39   :  { %842 = vmatprep.subr.mxu0 %v1154_v0  ;;  %v73_v13 = vld [vmem:[#allocation7 + $0x30] sm:$0xff]  ;;  %v72_v14 = vld [vmem:[#allocation7 + $0x20] sm:$0xff]  ;;  %p1127_p9 = por %p1126_p8, %p1125_p7 }
  0x3a   :  { %843 = vmatpush3.msra.mxu0 %v83_v3  ;;  %v71_v15 = vld [vmem:[#allocation7 + $0x10] sm:$0xff]  ;;  %v70_v16 = vld [vmem:[#allocation7] sm:$0xff] }
  0x3b   :  { %844 = vmatprep.subr.mxu0 %v1154_v0  ;;  %v69_v17 = vld [vmem:[#allocation2] sm:$0xff]  ;;  %v198_v19 = vld [vmem:[#allocation7 + $0x1e0] sm:$0xff]  ;;  %p1128_p10 = pnand %p1127_p9, %p1121_p6 }
  0x3c   :  { %845 = vmatpush3.msra.mxu0 %v82_v4  ;;  %v199_v18 = vld [vmem:[#allocation7 + $0x1f0] sm:$0xff]  ;;  %v196_v21 = vld [vmem:[#allocation7 + $0x1c0] sm:$0xff]  ;;  %v327_v4 = vld [vmem:[#allocation7 + $0x2e8] sm:$0xff] }
  0x3d   :  { %846 = vmatprep.subr.mxu0 %v1154_v0  ;;  %874 = vmatpush3.msra.mxu1 %v199_v18  ;;  %v197_v20 = vld [vmem:[#allocation7 + $0x1d0] sm:$0xff]  ;;  %v194_v23 = vld [vmem:[#allocation7 + $0x1a0] sm:$0xff]  ;;  %v313_v18 = vld [vmem:[#allocation7 + $0x278] sm:$0xff] }
  0x3e   :  { %847 = vmatpush3.msra.mxu0 %v81_v5  ;;  %875 = vmatprep.subr.mxu1 %v1154_v0  ;;  %v195_v22 = vld [vmem:[#allocation7 + $0x1b0] sm:$0xff]  ;;  %v192_v25 = vld [vmem:[#allocation7 + $0x180] sm:$0xff] }
  0x3f   :  { %848 = vmatprep.subr.mxu0 %v1154_v0  ;;  %876 = vmatpush3.msra.mxu1 %v198_v19  ;;  %v193_v24 = vld [vmem:[#allocation7 + $0x190] sm:$0xff]  ;;  %v190_v27 = vld [vmem:[#allocation7 + $0x160] sm:$0xff] }
  0x40   :  { %849 = vmatpush3.msra.mxu0 %v80_v6  ;;  %877 = vmatprep.subr.mxu1 %v1154_v0  ;;  %v191_v26 = vld [vmem:[#allocation7 + $0x170] sm:$0xff]  ;;  %v188_v29 = vld [vmem:[#allocation7 + $0x140] sm:$0xff]  ;;  %v325_v6 = vld [vmem:[#allocation7 + $0x2d8] sm:$0xff] }
  0x41   :  { %850 = vmatprep.subr.mxu0 %v1154_v0  ;;  %878 = vmatpush3.msra.mxu1 %v197_v20  ;;  %v189_v28 = vld [vmem:[#allocation7 + $0x150] sm:$0xff]  ;;  %v186_v31 = vld [vmem:[#allocation7 + $0x120] sm:$0xff]  ;;  %v311_v20 = vld [vmem:[#allocation7 + $0x268] sm:$0xff] }
  0x42   :  { %851 = vmatpush3.msra.mxu0 %v79_v7  ;;  %879 = vmatprep.subr.mxu1 %v1154_v0  ;;  %v187_v30 = vld [vmem:[#allocation7 + $0x130] sm:$0xff]  ;;  %v184_v33 = vld [vmem:[#allocation7 + $0x100] sm:$0xff] }
  0x43   :  { %852 = vmatprep.subr.mxu0 %v1154_v0  ;;  %880 = vmatpush3.msra.mxu1 %v196_v21  ;;  %v185_v32 = vld [vmem:[#allocation7 + $0x110] sm:$0xff]  ;;  %v86_v34 = vld [vmem:[#allocation8] ss:$0 sm:$0xff]  ;;  %v157_v59 = vld [vmem:[#allocation8 + $0x1] ss:$0 sm:$0xff] }
  0x44   :  { %853 = vmatpush3.msra.mxu0 %v78_v8  ;;  %881 = vmatprep.subr.mxu1 %v1154_v0  ;;  %v158_v61 = vld [vmem:[#allocation8 + $0x2] ss:$0 sm:$0xff]  ;;  %v328_v3 = vld [vmem:[#allocation7 + $0x2f0] sm:$0xff]  ;;  %v323_v8 = vld [vmem:[#allocation7 + $0x2c8] sm:$0xff] }
  0x45   :  { %854 = vmatprep.subr.mxu0 %v1154_v0  ;;  %882 = vmatpush3.msra.mxu1 %v195_v22  ;;  %v326_v5 = vld [vmem:[#allocation7 + $0x2e0] sm:$0xff]  ;;  %v324_v7 = vld [vmem:[#allocation7 + $0x2d0] sm:$0xff]  ;;  %v309_v22 = vld [vmem:[#allocation7 + $0x258] sm:$0xff] }
  0x46   :  { %855 = vmatpush3.msra.mxu0 %v77_v9  ;;  %883 = vmatprep.subr.mxu1 %v1154_v0  ;;  %v322_v9 = vld [vmem:[#allocation7 + $0x2c0] sm:$0xff]  ;;  %v312_v19 = vld [vmem:[#allocation7 + $0x270] sm:$0xff] }
  0x47   :  { %856 = vmatprep.subr.mxu0 %v1154_v0  ;;  %884 = vmatpush3.msra.mxu1 %v194_v23  ;;  %v310_v21 = vld [vmem:[#allocation7 + $0x260] sm:$0xff]  ;;  %v308_v23 = vld [vmem:[#allocation7 + $0x250] sm:$0xff] }
  0x48   :  { %857 = vmatpush3.msra.mxu0 %v76_v10  ;;  %885 = vmatprep.subr.mxu1 %v1154_v0  ;;  %v321_v10 = vld [vmem:[#allocation7 + $0x2b8] sm:$0xff] }
  0x49   :  { %858 = vmatprep.subr.mxu0 %v1154_v0  ;;  %886 = vmatpush3.msra.mxu1 %v193_v24  ;;  %v307_v24 = vld [vmem:[#allocation7 + $0x248] sm:$0xff] }
  0x4a   :  { %859 = vmatpush3.msra.mxu0 %v75_v11  ;;  %887 = vmatprep.subr.mxu1 %v1154_v0  ;;  %v320_v11 = vld [vmem:[#allocation7 + $0x2b0] sm:$0xff] }
  0x4b   :  { %860 = vmatprep.subr.mxu0 %v1154_v0  ;;  %888 = vmatpush3.msra.mxu1 %v192_v25  ;;  %v306_v25 = vld [vmem:[#allocation7 + $0x240] sm:$0xff] }
  0x4c   :  { %861 = vmatpush3.msra.mxu0 %v74_v12  ;;  %889 = vmatprep.subr.mxu1 %v1154_v0  ;;  %v319_v12 = vld [vmem:[#allocation7 + $0x2a8] sm:$0xff] }
  0x4d   :  { %862 = vmatprep.subr.mxu0 %v1154_v0  ;;  %890 = vmatpush3.msra.mxu1 %v191_v26  ;;  %v305_v26 = vld [vmem:[#allocation7 + $0x238] sm:$0xff] }
  0x4e   :  { %863 = vmatpush3.msra.mxu0 %v73_v13  ;;  %891 = vmatprep.subr.mxu1 %v1154_v0  ;;  %v318_v13 = vld [vmem:[#allocation7 + $0x2a0] sm:$0xff] }
  0x4f   :  { %864 = vmatprep.subr.mxu0 %v1154_v0  ;;  %892 = vmatpush3.msra.mxu1 %v190_v27  ;;  %v304_v27 = vld [vmem:[#allocation7 + $0x230] sm:$0xff] }
  0x50   :  { %865 = vmatpush3.msra.mxu0 %v72_v14  ;;  %893 = vmatprep.subr.mxu1 %v1154_v0  ;;  %v317_v14 = vld [vmem:[#allocation7 + $0x298] sm:$0xff] }
  0x51   :  { %866 = vmatprep.subr.mxu0 %v1154_v0  ;;  %894 = vmatpush3.msra.mxu1 %v189_v28  ;;  %v303_v28 = vld [vmem:[#allocation7 + $0x228] sm:$0xff] }
  0x52   :  { %867 = vmatpush3.msra.mxu0 %v71_v15  ;;  %895 = vmatprep.subr.mxu1 %v1154_v0  ;;  %v316_v15 = vld [vmem:[#allocation7 + $0x290] sm:$0xff] }
  0x53   :  { %868 = vmatprep.subr.mxu0 %v1154_v0  ;;  %896 = vmatpush3.msra.mxu1 %v188_v29  ;;  %v302_v29 = vld [vmem:[#allocation7 + $0x220] sm:$0xff] }
  0x54   :  { %869 = vmatpush3.msra.mxu0 %v70_v16  ;;  %897 = vmatprep.subr.mxu1 %v1154_v0  ;;  %v315_v16 = vld [vmem:[#allocation7 + $0x288] sm:$0xff] }
  0x55   :  { %871 = vmatmul.mubr.f32.vlgmr.msra.gmra.mxu0 %v69_v17  ;;  %898 = vmatpush3.msra.mxu1 %v187_v30  ;;  %v314_v17 = vld [vmem:[#allocation7 + $0x280] sm:$0xff]  ;;  %v301_v30 = vld [vmem:[#allocation7 + $0x218] sm:$0xff] }
  0x56   :  { %407 = vmatprep.mubr.f32.mxu0 %v1154_v0  ;;  %899 = vmatprep.subr.mxu1 %v1154_v0 }
  0x57   :  { %900 = vmatpush3.msra.mxu1 %v186_v31  ;;  %343 = vmatprep.subr.mxu0 %v329_v2  ;;  %v300_v31 = vld [vmem:[#allocation7 + $0x210] sm:$0xff] }
  0x58   :  { %901 = vmatprep.subr.mxu1 %v1154_v0  ;;  %344 = vmatpush1.msra.mxu0 %v328_v3 }
  0x59   :  { %902 = vmatpush3.msra.mxu1 %v185_v32  ;;  %345 = vmatprep.subr.mxu0 %v327_v4  ;;  %v299_v32 = vld [vmem:[#allocation7 + $0x208] sm:$0xff]  ;;  %v433_v4 = vld [vmem:[#allocation7 + $0x3d0] sm:$0xff] }
  0x5a   :  { %903 = vmatprep.subr.mxu1 %v1154_v0  ;;  %346 = vmatpush1.msra.mxu0 %v326_v5  ;;  %v432_v5 = vld [vmem:[#allocation7 + $0x3c0] sm:$0xff] }
  0x5b   :  { %904 = vmatpush3.msra.mxu1 %v184_v33  ;;  %347 = vmatprep.subr.mxu0 %v325_v6  ;;  %v298_v33 = vld [vmem:[#allocation7 + $0x200] sm:$0xff]  ;;  %v431_v6 = vld [vmem:[#allocation7 + $0x3b0] sm:$0xff] }
  0x5c   :  { %908 = vmatprep.subr.mxu1 %v1154_v0  ;;  %348 = vmatpush1.msra.mxu0 %v324_v7  ;;  %v430_v7 = vld [vmem:[#allocation7 + $0x3a0] sm:$0xff] }
  0x5d   :  { %349 = vmatprep.subr.mxu0 %v323_v8  ;;  %v429_v8 = vld [vmem:[#allocation7 + $0x390] sm:$0xff] }
  0x5e   :  { %350 = vmatpush1.msra.mxu0 %v322_v9  ;;  %v428_v9 = vld [vmem:[#allocation7 + $0x380] sm:$0xff] }
  0x5f   :  { %351 = vmatprep.subr.mxu0 %v321_v10  ;;  %v427_v10 = vld [vmem:[#allocation7 + $0x370] sm:$0xff] }
  0x60   :  { %352 = vmatpush1.msra.mxu0 %v320_v11  ;;  %v426_v11 = vld [vmem:[#allocation7 + $0x360] sm:$0xff] }
  0x61   :  { %353 = vmatprep.subr.mxu0 %v319_v12  ;;  %v425_v12 = vld [vmem:[#allocation7 + $0x350] sm:$0xff] }
  0x62   :  { %354 = vmatpush1.msra.mxu0 %v318_v13  ;;  %v424_v13 = vld [vmem:[#allocation7 + $0x340] sm:$0xff] }
  0x63   :  { %355 = vmatprep.subr.mxu0 %v317_v14  ;;  %v423_v14 = vld [vmem:[#allocation7 + $0x330] sm:$0xff] }
  0x64   :  { %356 = vmatpush1.msra.mxu0 %v316_v15  ;;  %v422_v15 = vld [vmem:[#allocation7 + $0x320] sm:$0xff] }
  0x65   :  { %357 = vmatprep.subr.mxu0 %v315_v16  ;;  %v421_v16 = vld [vmem:[#allocation7 + $0x310] sm:$0xff] }
  0x66   :  { %358 = vmatpush1.msra.mxu0 %v314_v17  ;;  %v420_v17 = vld [vmem:[#allocation7 + $0x300] sm:$0xff] }
  0x67   :  { %359 = vmatprep.subr.mxu0 %v313_v18  ;;  %v333_v18 = vlaneseq }
  0x68   :  { %360 = vmatpush1.msra.mxu0 %v312_v19 }
  0x69   :  { %361 = vmatprep.subr.mxu0 %v311_v20  ;;  %v334_v19 = vshrl.u32 %v333_v18, 7 }
  0x6a   :  { %362 = vmatpush1.msra.mxu0 %v310_v21  ;;  %v331_v21 = vld [vmem:[#allocation8 + $0x6] ss:$8 sm:$0x3] }
  0x6b   :  { %363 = vmatprep.subr.mxu0 %v309_v22  ;;  %v339_v20 = vsub.s32 1, %v334_v19 }
  0x6c   :  { %364 = vmatpush1.msra.mxu0 %v308_v23 }
  0x6d   :  { %365 = vmatprep.subr.mxu0 %v307_v24  ;;  %v340_v22 = vrot.slane %v331_v21, %v339_v20  ;;  %v662_v20 = vld [vmem:[#allocation7 + $0x5e0] sm:$0xff] }
  0x6e   :  { %366 = vmatpush1.msra.mxu0 %v306_v25 }
  0x6f   :  { %367 = vmatprep.subr.mxu0 %v305_v26 }
  0x70   :  { %368 = vmatpush1.msra.mxu0 %v304_v27 }
  0x71   :  { %369 = vmatprep.subr.mxu0 %v303_v28  ;;  %v335_v28 = vsub.s32 0, %v334_v19  ;;  %v663_v19 = vld [vmem:[#allocation7 + $0x5f0] sm:$0xff] }
  0x72   :  { %370 = vmatpush1.msra.mxu0 %v302_v29 }
  0x73   :  { %371 = vmatprep.subr.mxu0 %v301_v30  ;;  %v336_v29 = vrot.slane %v331_v21, %v335_v28  ;;  %v414_v30 = vld [vmem:[#allocation5] sm:$0xff]  ;;  %v661_v21 = vld [vmem:[#allocation7 + $0x5d0] sm:$0xff]  ;;  %v654_v28 = vld [vmem:[#allocation7 + $0x560] sm:$0xff] }
  0x74   :  { %372 = vmatpush1.msra.mxu0 %v300_v31 }
  0x75   :  { %373 = vmatprep.subr.mxu0 %v299_v32 }
  0x76   :  { %374 = vmatpush1.msra.mxu0 %v298_v33 }
  0x77   :  { %943 = vmatprep.subr.mxu0 %v1154_v0 }
 0x115   :  { %v153_v35 = vpop.f32.mrf.mxu0 }
 0x116   :  { %v154_v36 = vadd.f32 %v153_v35, %v86_v34  ;;  %v435_v34 = vld [vmem:[#allocation7 + $0x3f0] sm:$0xff]  ;;  %v434_v35 = vld [vmem:[#allocation7 + $0x3e0] sm:$0xff] }
 0x117   :  { %v872_v37 = vpop.f32.mrf.mxu0 }
 0x118   :  { %v159_v38 = vrot.slane %v154_v36, 4  ;;  %v165_v39 = vmul.f32 %v154_v36, %v154_v36 }
 0x11a   :  { %v160_v40 = vadd.f32 %v159_v38, %v154_v36  ;;  %v166_v41 = vrot.slane %v165_v39, 4 }
 0x11c   :  { %v161_v42 = vrot.slane %v160_v40, 2  ;;  %v167_v43 = vadd.f32 %v166_v41, %v165_v39 }
 0x11e   :  { %v162_v44 = vadd.f32 %v161_v42, %v160_v40  ;;  %v168_v45 = vrot.slane %v167_v43, 2 }
 0x120   :  { %v163_v46 = vrot.slane %v162_v44, 1  ;;  %v169_v47 = vadd.f32 %v168_v45, %v167_v43 }
 0x122   :  { %v164_v48 = vadd.f32 %v163_v46, %v162_v44  ;;  %v170_v49 = vrot.slane %v169_v47, 1 }
 0x124   :  { %v171_v50 = vadd.f32 %v170_v49, %v169_v47  ;;  %v172_v51 = vmul.f32 0.125, %v164_v48 }
 0x126   :  { %v173_v52 = vmul.f32 0.125, %v171_v50  ;;  %v174_v53 = vmul.f32 %v172_v51, %v172_v51  ;;  %v177_v57 = vsub.f32 %v154_v36, %v172_v51  ;;  %v200_v36 = vld [vmem:[#allocation8 + $0x3] ss:$0 sm:$0xff] }
 0x128   :  { %v175_v54 = vsub.f32 %v173_v52, %v174_v53 }
 0x12a   :  { %v176_v55 = vmax.f32 %v175_v54, 0.0 }
 0x12c   :  { %v178_v56 = vadd.f32 1e-05, %v176_v55 }
 0x12e   :  { %1022 = vrsqrt.f32 %v178_v56 }
 0x13b   :  { %v1023_v58 = vpop.eup %1022 }
 0x13c   :  { %v180_v60 = vmul.f32 %v1023_v58, %v177_v57 }
 0x13e   :  { %v181_v62 = vmul.f32 %v180_v60, %v157_v59 }
 0x140   :  { %v182_v63 = vadd.f32 %v181_v62, %v158_v61  ;;  %v271_v61 = vld [vmem:[#allocation8 + $0x4] ss:$0 sm:$0xff] }
 0x142   :  { %1024 = vtanh.f32 %v182_v63  ;;  %v272_v63 = vld [vmem:[#allocation8 + $0x5] ss:$0 sm:$0xff] }
 0x14f   :  { %v1025_v1 = vpop.eup %1024 }
 0x150   :  { %906 = vmatmul.mubr.f32.vlgmr.msra.gmra.mxu1 %v1025_v1 }
 0x151   :  { %940 = vmatprep.mubr.msk.f32.mxu1 %vm1155_vm0, %v1154_v0  ;;  %909 = vmatpush3.msra.mxu1 %v435_v34 }
 0x152   :  { %910 = vmatprep.subr.mxu1 %v1154_v0 }
 0x153   :  { %911 = vmatpush3.msra.mxu1 %v434_v35  ;;  %v549_v35 = vld [vmem:[#allocation7 + $0x4f0] sm:$0xff] }
 0x154   :  { %912 = vmatprep.subr.mxu1 %v1154_v0 }
 0x155   :  { %913 = vmatpush3.msra.mxu1 %v433_v4 }
 0x156   :  { %914 = vmatprep.subr.mxu1 %v1154_v0 }
 0x157   :  { %915 = vmatpush3.msra.mxu1 %v432_v5 }
 0x158   :  { %916 = vmatprep.subr.mxu1 %v1154_v0 }
 0x159   :  { %917 = vmatpush3.msra.mxu1 %v431_v6 }
 0x15a   :  { %918 = vmatprep.subr.mxu1 %v1154_v0 }
 0x15b   :  { %919 = vmatpush3.msra.mxu1 %v430_v7 }
 0x15c   :  { %920 = vmatprep.subr.mxu1 %v1154_v0 }
 0x15d   :  { %921 = vmatpush3.msra.mxu1 %v429_v8 }
 0x15e   :  { %922 = vmatprep.subr.mxu1 %v1154_v0 }
 0x15f   :  { %923 = vmatpush3.msra.mxu1 %v428_v9 }
 0x160   :  { %924 = vmatprep.subr.mxu1 %v1154_v0 }
 0x161   :  { %925 = vmatpush3.msra.mxu1 %v427_v10 }
 0x162   :  { %926 = vmatprep.subr.mxu1 %v1154_v0 }
 0x163   :  { %927 = vmatpush3.msra.mxu1 %v426_v11 }
 0x164   :  { %928 = vmatprep.subr.mxu1 %v1154_v0 }
 0x165   :  { %929 = vmatpush3.msra.mxu1 %v425_v12 }
 0x166   :  { %930 = vmatprep.subr.mxu1 %v1154_v0 }
 0x167   :  { %931 = vmatpush3.msra.mxu1 %v424_v13  ;;  %v507_v13 = vld [vmem:[#allocation8 + $0x10] ss:$0 sm:$0xff] }
 0x168   :  { %932 = vmatprep.subr.mxu1 %v1154_v0 }
 0x169   :  { %933 = vmatpush3.msra.mxu1 %v423_v14 }
 0x16a   :  { %934 = vmatprep.subr.mxu1 %v1154_v0 }
 0x16b   :  { %935 = vmatpush3.msra.mxu1 %v422_v15  ;;  %v508_v15 = vld [vmem:[#allocation8 + $0x11] ss:$0 sm:$0xff] }
 0x16c   :  { %936 = vmatprep.subr.mxu1 %v1154_v0 }
 0x16d   :  { %937 = vmatpush3.msra.mxu1 %v421_v16 }
 0x16e   :  { %938 = vmatprep.subr.mxu1 %v1154_v0 }
 0x16f   :  { %939 = vmatpush3.msra.mxu1 %v420_v17 }
 0x170   :  { %978 = vmatprep.subr.mxu1 %v1154_v0 }
 0x210   :  { %v267_v37 = vpop.f32.mrf.mxu1 }
 0x211   :  { %v268_v38 = vadd.f32 %v267_v37, %v200_v36  ;;  %v548_v36 = vld [vmem:[#allocation7 + $0x4e0] sm:$0xff]  ;;  %v547_v37 = vld [vmem:[#allocation7 + $0x4d0] sm:$0xff] }
 0x212   :  { %v907_v39 = vpop.f32.mrf.mxu1 }
 0x213   :  { %v273_v40 = vrot.slane %v268_v38, 4  ;;  %v279_v41 = vmul.f32 %v268_v38, %v268_v38  ;;  %v545_v39 = vld [vmem:[#allocation7 + $0x4b0] sm:$0xff] }
 0x215   :  { %v274_v42 = vadd.f32 %v273_v40, %v268_v38  ;;  %v280_v43 = vrot.slane %v279_v41, 4  ;;  %v544_v40 = vld [vmem:[#allocation7 + $0x4a0] sm:$0xff] }
 0x217   :  { %v275_v44 = vrot.slane %v274_v42, 2  ;;  %v281_v45 = vadd.f32 %v280_v43, %v279_v41  ;;  %v543_v41 = vld [vmem:[#allocation7 + $0x490] sm:$0xff] }
 0x218   :  { %v541_v43 = vld [vmem:[#allocation7 + $0x470] sm:$0xff] }
 0x219   :  { %v276_v46 = vadd.f32 %v275_v44, %v274_v42  ;;  %v282_v47 = vrot.slane %v281_v45, 2  ;;  %v542_v42 = vld [vmem:[#allocation7 + $0x480] sm:$0xff] }
 0x21a   :  { %v540_v44 = vld [vmem:[#allocation7 + $0x460] sm:$0xff] }
 0x21b   :  { %v277_v48 = vrot.slane %v276_v46, 1  ;;  %v283_v49 = vadd.f32 %v282_v47, %v281_v45  ;;  %v539_v45 = vld [vmem:[#allocation7 + $0x450] sm:$0xff] }
 0x21c   :  { %v537_v47 = vld [vmem:[#allocation7 + $0x430] sm:$0xff] }
 0x21d   :  { %v278_v50 = vadd.f32 %v277_v48, %v276_v46  ;;  %v284_v51 = vrot.slane %v283_v49, 1  ;;  %v538_v46 = vld [vmem:[#allocation7 + $0x440] sm:$0xff] }
 0x21e   :  { %v536_v48 = vld [vmem:[#allocation7 + $0x420] sm:$0xff] }
 0x21f   :  { %v285_v52 = vadd.f32 %v284_v51, %v283_v49  ;;  %v286_v53 = vmul.f32 0.125, %v278_v50  ;;  %v535_v49 = vld [vmem:[#allocation7 + $0x410] sm:$0xff]  ;;  %v534_v50 = vld [vmem:[#allocation7 + $0x400] sm:$0xff] }
 0x220   :  { %v436_v51 = vld [vmem:[#allocation8 + $0x7] ss:$0 sm:$0xff] }
 0x221   :  { %v287_v54 = vmul.f32 0.125, %v285_v52  ;;  %v288_v55 = vmul.f32 %v286_v53, %v286_v53  ;;  %v291_v59 = vsub.f32 %v268_v38, %v286_v53  ;;  %v546_v38 = vld [vmem:[#allocation7 + $0x4c0] sm:$0xff] }
 0x223   :  { %v289_v56 = vsub.f32 %v287_v54, %v288_v55 }
 0x225   :  { %v290_v57 = vmax.f32 %v289_v56, 0.0 }
 0x227   :  { %v292_v58 = vadd.f32 1e-05, %v290_v57 }
 0x229   :  { %1026 = vrsqrt.f32 %v292_v58 }
 0x236   :  { %v1027_v60 = vpop.eup %1026 }
 0x237   :  { %v294_v62 = vmul.f32 %v1027_v60, %v291_v59 }
 0x239   :  { %v295_v1 = vmul.f32 %v294_v62, %v271_v61 }
 0x23b   :  { %v296_v2 = vadd.f32 %v295_v1, %v272_v63 }
 0x23d   :  { %1028 = vtanh.f32 %v296_v2 }
 0x24a   :  { %v1029_v3 = vpop.eup %1028 }
 0x24b   :  { %408 = vmatmul.mubr.f32.vlgmr.msra.gmra.mxu0 %v1029_v3 }
 0x24c   :  { %975 = vmatprep.mubr.msk.f32.mxu0 %vm1155_vm0, %v1154_v0  ;;  %944 = vmatpush3.msra.mxu0 %v549_v35  ;;  %v550_v35 = vld [vmem:[#allocation8 + $0x12] ss:$0 sm:$0xff] }
 0x24d   :  { %945 = vmatprep.subr.mxu0 %v1154_v0 }
 0x24e   :  { %946 = vmatpush3.msra.mxu0 %v548_v36 }
 0x24f   :  { %947 = vmatprep.subr.mxu0 %v1154_v0 }
 0x250   :  { %948 = vmatpush3.msra.mxu0 %v547_v37 }
 0x251   :  { %949 = vmatprep.subr.mxu0 %v1154_v0 }
 0x252   :  { %950 = vmatpush3.msra.mxu0 %v546_v38 }
 0x253   :  { %951 = vmatprep.subr.mxu0 %v1154_v0 }
 0x254   :  { %952 = vmatpush3.msra.mxu0 %v545_v39 }
 0x255   :  { %953 = vmatprep.subr.mxu0 %v1154_v0 }
 0x256   :  { %954 = vmatpush3.msra.mxu0 %v544_v40 }
 0x257   :  { %955 = vmatprep.subr.mxu0 %v1154_v0 }
 0x258   :  { %956 = vmatpush3.msra.mxu0 %v543_v41 }
 0x259   :  { %957 = vmatprep.subr.mxu0 %v1154_v0 }
 0x25a   :  { %958 = vmatpush3.msra.mxu0 %v542_v42 }
 0x25b   :  { %959 = vmatprep.subr.mxu0 %v1154_v0 }
 0x25c   :  { %960 = vmatpush3.msra.mxu0 %v541_v43 }
 0x25d   :  { %961 = vmatprep.subr.mxu0 %v1154_v0 }
 0x25e   :  { %962 = vmatpush3.msra.mxu0 %v540_v44 }
 0x25f   :  { %963 = vmatprep.subr.mxu0 %v1154_v0 }
 0x260   :  { %964 = vmatpush3.msra.mxu0 %v539_v45 }
 0x261   :  { %965 = vmatprep.subr.mxu0 %v1154_v0 }
 0x262   :  { %966 = vmatpush3.msra.mxu0 %v538_v46 }
 0x263   :  { %967 = vmatprep.subr.mxu0 %v1154_v0 }
 0x264   :  { %968 = vmatpush3.msra.mxu0 %v537_v47 }
 0x265   :  { %969 = vmatprep.subr.mxu0 %v1154_v0 }
 0x266   :  { %970 = vmatpush3.msra.mxu0 %v536_v48 }
 0x267   :  { %971 = vmatprep.subr.mxu0 %v1154_v0 }
 0x268   :  { %972 = vmatpush3.msra.mxu0 %v535_v49 }
 0x269   :  { %973 = vmatprep.subr.mxu0 %v1154_v0 }
 0x26a   :  { %974 = vmatpush3.msra.mxu0 %v534_v50 }
 0x30b   :  { %v409_v23 = vpop.f32.mrf.mxu0 }
 0x30c   :  { %v410_v32 = vadd.f32 %v409_v23, %v336_v29  ;;  %v659_v23 = vld [vmem:[#allocation7 + $0x5b0] sm:$0xff] }
 0x30d   :  { %v411_v24 = vpop.f32.mrf.mxu0  ;;  %v653_v29 = vld [vmem:[#allocation7 + $0x550] sm:$0xff] }
 0x30e   :  { %v412_v25 = vadd.f32 %v411_v24, %v340_v22  ;;  %v660_v22 = vld [vmem:[#allocation7 + $0x5c0] sm:$0xff] }
 0x30f   :  { %v658_v24 = vld [vmem:[#allocation7 + $0x5a0] sm:$0xff] }
 0x310   :  { %v415_v26 = vmul.f32 0.5, %v412_v25  ;;  %v657_v25 = vld [vmem:[#allocation7 + $0x590] sm:$0xff] }
 0x312   :  { %v416_v27 = vmul.f32 1.442695, %v415_v26  ;;  %v656_v26 = vld [vmem:[#allocation7 + $0x580] sm:$0xff] }
 0x314   :  { %1030 = vpow2.f32 %v416_v27  ;;  %v655_v27 = vld [vmem:[#allocation7 + $0x570] sm:$0xff] }
 0x321   :  { %v1031_v31 = vpop.eup %1030 }
 0x322   :  { %v418_v33 = vmul.f32 %v1031_v31, %v414_v30  ;;  %v652_v30 = vld [vmem:[#allocation7 + $0x540] sm:$0xff]  ;;  %v651_v31 = vld [vmem:[#allocation7 + $0x530] sm:$0xff] }
 0x324   :  { %v419_v34 = vadd.f32 %v418_v33, %v410_v32  ;;  %v650_v32 = vld [vmem:[#allocation7 + $0x520] sm:$0xff]  ;;  %v649_v33 = vld [vmem:[#allocation7 + $0x510] sm:$0xff] }
 0x326   :  { %941 = vmatmul.mubr.f32.vlgmr.msra.gmra.mxu1 %v419_v34  ;;  %v648_v34 = vld [vmem:[#allocation7 + $0x500] sm:$0xff] }
 0x327   :  { %1010 = vmatprep.mubr.msk.f32.mxu1 %vm1155_vm0, %v1154_v0  ;;  %979 = vmatpush3.msra.mxu1 %v663_v19 }
 0x328   :  { %980 = vmatprep.subr.mxu1 %v1154_v0 }
 0x329   :  { %981 = vmatpush3.msra.mxu1 %v662_v20 }
 0x32a   :  { %982 = vmatprep.subr.mxu1 %v1154_v0 }
 0x32b   :  { %983 = vmatpush3.msra.mxu1 %v661_v21 }
 0x32c   :  { %984 = vmatprep.subr.mxu1 %v1154_v0 }
 0x32d   :  { %985 = vmatpush3.msra.mxu1 %v660_v22 }
 0x32e   :  { %986 = vmatprep.subr.mxu1 %v1154_v0 }
 0x32f   :  { %987 = vmatpush3.msra.mxu1 %v659_v23 }
 0x330   :  { %988 = vmatprep.subr.mxu1 %v1154_v0 }
 0x331   :  { %989 = vmatpush3.msra.mxu1 %v658_v24 }
 0x332   :  { %990 = vmatprep.subr.mxu1 %v1154_v0 }
 0x333   :  { %991 = vmatpush3.msra.mxu1 %v657_v25 }
 0x334   :  { %992 = vmatprep.subr.mxu1 %v1154_v0 }
 0x335   :  { %993 = vmatpush3.msra.mxu1 %v656_v26 }
 0x336   :  { %994 = vmatprep.subr.mxu1 %v1154_v0 }
 0x337   :  { %995 = vmatpush3.msra.mxu1 %v655_v27 }
 0x338   :  { %996 = vmatprep.subr.mxu1 %v1154_v0 }
 0x339   :  { %997 = vmatpush3.msra.mxu1 %v654_v28 }
 0x33a   :  { %998 = vmatprep.subr.mxu1 %v1154_v0 }
 0x33b   :  { %999 = vmatpush3.msra.mxu1 %v653_v29 }
 0x33c   :  { %1000 = vmatprep.subr.mxu1 %v1154_v0 }
 0x33d   :  { %1001 = vmatpush3.msra.mxu1 %v652_v30 }
 0x33e   :  { %1002 = vmatprep.subr.mxu1 %v1154_v0 }
 0x33f   :  { %1003 = vmatpush3.msra.mxu1 %v651_v31 }
 0x340   :  { %1004 = vmatprep.subr.mxu1 %v1154_v0 }
 0x341   :  { %1005 = vmatpush3.msra.mxu1 %v650_v32 }
 0x342   :  { %1006 = vmatprep.subr.mxu1 %v1154_v0 }
 0x343   :  { %1007 = vmatpush3.msra.mxu1 %v649_v33 }
 0x344   :  { %1008 = vmatprep.subr.mxu1 %v1154_v0 }
 0x345   :  { %1009 = vmatpush3.msra.mxu1 %v648_v34 }
 0x3e6   :  { %v503_v52 = vpop.f32.mrf.mxu1 }
 0x3e7   :  { %v504_v53 = vadd.f32 %v503_v52, %v436_v51 }
 0x3e8   :  { %v942_v54 = vpop.f32.mrf.mxu1 }
 0x3e9   :  { %v509_v55 = vrot.slane %v504_v53, 4  ;;  %v515_v56 = vmul.f32 %v504_v53, %v504_v53 }
 0x3eb   :  { %v510_v57 = vadd.f32 %v509_v55, %v504_v53  ;;  %v516_v58 = vrot.slane %v515_v56, 4 }
 0x3ed   :  { %v511_v59 = vrot.slane %v510_v57, 2  ;;  %v517_v60 = vadd.f32 %v516_v58, %v515_v56 }
 0x3ef   :  { %v512_v61 = vadd.f32 %v511_v59, %v510_v57  ;;  %v518_v62 = vrot.slane %v517_v60, 2  ;;  %v621_v59 = vld [vmem:[#allocation8 + $0x13] ss:$0 sm:$0xff] }
 0x3f1   :  { %v513_v63 = vrot.slane %v512_v61, 1  ;;  %v519_v1 = vadd.f32 %v518_v62, %v517_v60 }
 0x3f3   :  { %v514_v2 = vadd.f32 %v513_v63, %v512_v61  ;;  %v520_v3 = vrot.slane %v519_v1, 1  ;;  %v622_v61 = vld [vmem:[#allocation8 + $0x14] ss:$0 sm:$0xff] }
 0x3f5   :  { %v521_v4 = vadd.f32 %v520_v3, %v519_v1  ;;  %v522_v5 = vmul.f32 0.125, %v514_v2  ;;  %v664_v2 = vld [vmem:[#allocation8 + $0x15] ss:$0 sm:$0xff] }
 0x3f7   :  { %v523_v6 = vmul.f32 0.125, %v521_v4  ;;  %v524_v7 = vmul.f32 %v522_v5, %v522_v5  ;;  %v527_v11 = vsub.f32 %v504_v53, %v522_v5 }
 0x3f9   :  { %v525_v8 = vsub.f32 %v523_v6, %v524_v7 }
 0x3fb   :  { %v526_v9 = vmax.f32 %v525_v8, 0.0 }
 0x3fd   :  { %v528_v10 = vadd.f32 1e-05, %v526_v9 }
 0x3ff   :  { %1032 = vrsqrt.f32 %v528_v10 }
 0x40c   :  { %v1033_v12 = vpop.eup %1032 }
 0x40d   :  { %v530_v14 = vmul.f32 %v1033_v12, %v527_v11 }
 0x40f   :  { %v531_v16 = vmul.f32 %v530_v14, %v507_v13 }
 0x411   :  { %v532_v17 = vadd.f32 %v531_v16, %v508_v15 }
 0x413   :  { %1034 = vtanh.f32 %v532_v17 }
 0x420   :  { %v1035_v18 = vpop.eup %1034 }
 0x421   :  { %976 = vmatmul.mubr.f32.vlgmr.msra.gmra.mxu0 %v1035_v18 }
 0x4e1   :  { %v617_v36 = vpop.f32.mrf.mxu0 }
 0x4e2   :  { %v618_v37 = vadd.f32 %v617_v36, %v550_v35 }
 0x4e3   :  { %v977_v38 = vpop.f32.mrf.mxu0 }
 0x4e4   :  { %v623_v39 = vrot.slane %v618_v37, 4  ;;  %v629_v40 = vmul.f32 %v618_v37, %v618_v37 }
 0x4e6   :  { %v624_v41 = vadd.f32 %v623_v39, %v618_v37  ;;  %v630_v42 = vrot.slane %v629_v40, 4 }
 0x4e8   :  { %v625_v43 = vrot.slane %v624_v41, 2  ;;  %v631_v44 = vadd.f32 %v630_v42, %v629_v40 }
 0x4ea   :  { %v626_v45 = vadd.f32 %v625_v43, %v624_v41  ;;  %v632_v46 = vrot.slane %v631_v44, 2 }
 0x4ec   :  { %v627_v47 = vrot.slane %v626_v45, 1  ;;  %v633_v48 = vadd.f32 %v632_v46, %v631_v44 }
 0x4ee   :  { %v628_v49 = vadd.f32 %v627_v47, %v626_v45  ;;  %v634_v50 = vrot.slane %v633_v48, 1 }
 0x4f0   :  { %v635_v51 = vadd.f32 %v634_v50, %v633_v48  ;;  %v636_v52 = vmul.f32 0.125, %v628_v49 }
 0x4f2   :  { %v637_v0 = vmul.f32 0.125, %v635_v51  ;;  %v638_v53 = vmul.f32 %v636_v52, %v636_v52  ;;  %v641_v57 = vsub.f32 %v618_v37, %v636_v52 }
 0x4f4   :  { %v639_v54 = vsub.f32 %v637_v0, %v638_v53 }
 0x4f6   :  { %v640_v55 = vmax.f32 %v639_v54, 0.0 }
 0x4f8   :  { %v642_v56 = vadd.f32 1e-05, %v640_v55 }
 0x4fa   :  { %1036 = vrsqrt.f32 %v642_v56 }
 0x507   :  { %v1037_v58 = vpop.eup %1036 }
 0x508   :  { %v644_v60 = vmul.f32 %v1037_v58, %v641_v57 }
 0x50a   :  { %v645_v62 = vmul.f32 %v644_v60, %v621_v59 }
 0x50c   :  { %v646_v63 = vadd.f32 %v645_v62, %v622_v61 }
 0x50e   :  { %1038 = vtanh.f32 %v646_v63 }
 0x51b   :  { %v1039_v1 = vpop.eup %1038 }
 0x51c   :  { %1011 = vmatmul.mubr.f32.vlgmr.msra.gmra.mxu1 %v1039_v1 }
 0x5dc   :  { %v731_v3 = vpop.f32.mrf.mxu1 }
 0x5dd   :  { %v732_v4 = vadd.f32 %v731_v3, %v664_v2 }
 0x5de   :  { %v1012_v5 = vpop.f32.mrf.mxu1 }
 0x5df   :  { %735 = vst [vmem:[#allocation10] sm:$0xff] %v732_v4 }
 0x5e0   :  { %1131 = shalt.err (!%p1128_p10)
}
 0x5e1   :  { %745 = dma.vmem_to_hbm [thread:$0]  %s743_s3, 128, %s1292_s4, [#allocation4]  }
 0x5e2   :  { %1146 = dma.done.wait [#allocation4], 128  }
 0x5e3   :  { %1147 = vsyncadd [#allocation4], 4294967168 }
 0x5e4   :  { %749 = vsyncpa [#allocation3], 1 }
 0x5e5   :  { %750 = vsyncpa [#allocation6], 1 }
 0x5e6   :  { %751 = vsyncpa [#allocation9], 1 }
 0x5e7   :  { %752 = vsyncpa [#allocation4], 1 }

</bundles_post_ra>
